<compile_context>
chip_gen: v6e
topology: v6e:2x2x1
jax: 0.10.0
libtpu: 0.0.40
codegen_flags: <defaults>
</compile_context>

<pallas_src>
import functools

import jax
import jax.numpy as jnp
from jax import lax
from jax.experimental import pallas as pl
from jax.experimental.pallas import tpu as pltpu

# Set to jnp.bfloat16 on v6e/v7x for ~2x HBM/MXU on the conv matmul
# (accumulation stays float32 via preferred_element_type).
MATMUL_DTYPE = jnp.float32
_TILE_M = 512        # rows of the flattened N*H*W axis per grid step
_LANE = 128          # lane-dense channel padding
_BN_EPS = 1e-5       # nn.BatchNorm2d default


def _round_up(x, m):
    return (x + m - 1) // m * m


# ----------------------------- Pallas kernels --------------------------------

def _matmul_stats_kernel(p_ref, w_ref, y_ref, sum_ref, ssq_ref):
    """Pass 1: y = patches @ w (f32 MXU accum); per-channel sum / sum-of-squares."""
    i = pl.program_id(0)
    y = jnp.dot(p_ref[...], w_ref[...], preferred_element_type=jnp.float32)
    y_ref[...] = y

    @pl.when(i == 0)
    def _init():
        sum_ref[...] = jnp.zeros_like(sum_ref)
        ssq_ref[...] = jnp.zeros_like(ssq_ref)

    sum_ref[...] += jnp.sum(y, axis=0, keepdims=True)
    ssq_ref[...] += jnp.sum(y * y, axis=0, keepdims=True)


def _scale_shift_relu_kernel(y_ref, scale_ref, shift_ref, o_ref):
    """Pass 2: out = relu(y * scale + shift)   (BN affine folded per channel)."""
    o_ref[...] = jnp.maximum(y_ref[...] * scale_ref[...] + shift_ref[...], 0.0)


def _matmul_bias_kernel(x_ref, w_ref, b_ref, o_ref):
    """1x1 conv: out = x @ w + b."""
    o_ref[...] = (
        jnp.dot(x_ref[...], w_ref[...], preferred_element_type=jnp.float32)
        + b_ref[...])


# ------------------------- pallas_call builders (cached) ---------------------

@functools.lru_cache(maxsize=None)
def _conv_stats_call(mp, kp, cp, tile_m, in_dtype_name):
    bpe = jnp.dtype(in_dtype_name).itemsize
    cost = pl.CostEstimate(
        flops=2 * mp * kp * cp, transcendentals=0,
        bytes_accessed=mp * kp * bpe + kp * cp * bpe + mp * cp * 4 + 2 * cp * 4)
    return pl.pallas_call(
        _matmul_stats_kernel,
        out_shape=(jax.ShapeDtypeStruct((mp, cp), jnp.float32),
                   jax.ShapeDtypeStruct((1, cp), jnp.float32),
                   jax.ShapeDtypeStruct((1, cp), jnp.float32)),
        grid=(mp // tile_m,),
        in_specs=[
            # v7x note: per-step footprint ~ tile_m*(kp+cp)*4*2 (double buffer)
            # + kp*cp*4 << 32 MiB scoped default; pl.Buffered(3) on this spec is
            # an optional extra-prefetch knob there.
            pl.BlockSpec((tile_m, kp), lambda i: (i, 0)),
            pl.BlockSpec((kp, cp), lambda i: (0, 0)),      # weights stay resident
        ],
        out_specs=(
            pl.BlockSpec((tile_m, cp), lambda i: (i, 0)),  # lane-dense conv result
            pl.BlockSpec((1, cp), lambda i: (0, 0)),       # revisited accumulator
            pl.BlockSpec((1, cp), lambda i: (0, 0)),       # revisited accumulator
        ),
        compiler_params=pltpu.CompilerParams(
            dimension_semantics=("arbitrary",)),  # stats accumulate across M tiles
        cost_estimate=cost,
    )


@functools.lru_cache(maxsize=None)
def _norm_relu_call(mp, cp, tile_m):
    cost = pl.CostEstimate(flops=3 * mp * cp, transcendentals=0,
                           bytes_accessed=2 * mp * cp * 4 + 2 * cp * 4)
    return pl.pallas_call(
        _scale_shift_relu_kernel,
        out_shape=jax.ShapeDtypeStruct((mp, cp), jnp.float32),
        grid=(mp // tile_m,),
        in_specs=[pl.BlockSpec((tile_m, cp), lambda i: (i, 0)),
                  pl.BlockSpec((1, cp), lambda i: (0, 0)),
                  pl.BlockSpec((1, cp), lambda i: (0, 0))],
        out_specs=pl.BlockSpec((tile_m, cp), lambda i: (i, 0)),
        compiler_params=pltpu.CompilerParams(
            dimension_semantics=("parallel",)),   # independent tiles -> megacore
        cost_estimate=cost,
    )


@functools.lru_cache(maxsize=None)
def _matmul_bias_call(mp, kp, cp, tile_m):
    cost = pl.CostEstimate(
        flops=2 * mp * kp * cp, transcendentals=0,
        bytes_accessed=mp * kp * 4 + kp * cp * 4 + cp * 4 + mp * cp * 4)
    return pl.pallas_call(
        _matmul_bias_kernel,
        out_shape=jax.ShapeDtypeStruct((mp, cp), jnp.float32),
        grid=(mp // tile_m,),
        in_specs=[pl.BlockSpec((tile_m, kp), lambda i: (i, 0)),
                  pl.BlockSpec((kp, cp), lambda i: (0, 0)),
                  pl.BlockSpec((1, cp), lambda i: (0, 0))],
        out_specs=pl.BlockSpec((tile_m, cp), lambda i: (i, 0)),
        compiler_params=pltpu.CompilerParams(dimension_semantics=("parallel",)),
        cost_estimate=cost,
    )


# ----------------------------- layer wrappers --------------------------------

def conv3x3_bn_relu(x, w, b, gamma, beta, eps=_BN_EPS):
    """Conv2d(3x3, pad=1) -> BatchNorm2d (training-mode batch stats, biased var)
    -> ReLU, via the two-pass tiled Pallas kernels.

    The conv bias `b` is accepted for parameter parity with the PyTorch module
    but intentionally NOT applied: a per-channel constant added before
    batch-statistics BN is exactly cancelled by the mean subtraction.
    """
    del b  # dead under training-mode BN (perf-review item)
    n, cin, h, wdt = x.shape
    cout = w.shape[0]

    # --- glue: NCHW -> NHWC, zero pad, im2col with feature order (ky, kx, cin).
    # TODO(synk): replace host-side im2col (9x HBM read amplification of the
    # input activation) with in-kernel accumulation over the 9 taps (K = Cin per
    # tap) on shifted slices of a padded NHWC block -- the remaining large lever
    # from the perf review.
    xh = jnp.transpose(x, (0, 2, 3, 1))
    xp = jnp.pad(xh, ((0, 0), (1, 1), (1, 1), (0, 0)))
    cols = [xp[:, dy:dy + h, dx:dx + wdt, :] for dy in range(3) for dx in range(3)]
    patches = jnp.concatenate(cols, axis=-1).reshape(n * h * wdt, 9 * cin)
    wmat = jnp.transpose(w, (2, 3, 1, 0)).reshape(9 * cin, cout)

    m, k = patches.shape
    kp = _round_up(k, 8)                     # sublane-aligned K
    cp = _round_up(cout, _LANE)              # lane-dense output channels
    tile_m = min(_TILE_M, _round_up(m, 8))
    mp = _round_up(m, tile_m)

    patches = jnp.pad(patches, ((0, mp - m), (0, kp - k))).astype(MATMUL_DTYPE)
    wmat = jnp.pad(wmat, ((0, kp - k), (0, cp - cout))).astype(MATMUL_DTYPE)

    y, csum, cssq = _conv_stats_call(
        mp, kp, cp, tile_m, jnp.dtype(MATMUL_DTYPE).name)(patches, wmat)

    # Tiny per-channel reduction -> folded BN affine (scale / shift).  Zero-padded
    # rows contribute 0 to both sums, so divide by the true M, not the padded one.
    inv_m = 1.0 / m
    mean = csum[0] * inv_m
    var = jnp.maximum(cssq[0] * inv_m - mean * mean, 0.0)   # biased variance
    gamma_p = jnp.pad(gamma, (0, cp - cout))
    beta_p = jnp.pad(beta, (0, cp - cout))
    scale = gamma_p * lax.rsqrt(var + eps)
    shift = beta_p - mean * scale

    out = _norm_relu_call(mp, cp, tile_m)(
        y, scale.reshape(1, cp), shift.reshape(1, cp))
    out = out[:m, :cout].reshape(n, h, wdt, cout)
    return jnp.transpose(out, (0, 3, 1, 2))


def conv1x1_bias(x, w, b):
    """OutConv: Conv2d(1x1) with bias (no BN / ReLU)."""
    n, cin, h, wdt = x.shape
    cout = w.shape[0]
    xf = jnp.transpose(x, (0, 2, 3, 1)).reshape(n * h * wdt, cin)
    wmat = w.reshape(cout, cin).T

    m, k = xf.shape
    kp = _round_up(k, 8)
    cp = _round_up(cout, _LANE)
    tile_m = min(_TILE_M, _round_up(m, 8))
    mp = _round_up(m, tile_m)

    xf = jnp.pad(xf, ((0, mp - m), (0, kp - k)))
    wmat = jnp.pad(wmat, ((0, kp - k), (0, cp - cout)))
    bb = jnp.pad(b, (0, cp - cout)).reshape(1, cp)

    out = _matmul_bias_call(mp, kp, cp, tile_m)(xf, wmat, bb)
    out = out[:m, :cout].reshape(n, h, wdt, cout)
    return jnp.transpose(out, (0, 3, 1, 2))


# ------------------------------- jnp glue ------------------------------------

def maxpool2(x):
    n, c, h, w = x.shape
    return x.reshape(n, c, h // 2, 2, w // 2, 2).max(axis=(3, 5))


def upsample2_nearest(x):
    return jnp.repeat(jnp.repeat(x, 2, axis=2), 2, axis=3)


# ----------------------------- model wiring ----------------------------------

def discriminator_forward(params, x, conv3_fn, conv1_fn):
    """Same dataflow as Discriminator.forward (Up in its runnable bilinear=False
    configuration: bottom_conv -> nearest upsample -> pad -> cat -> DoubleConv)."""

    def conv(p, h):
        return conv3_fn(h, p['w'], p['b'], p['gamma'], p['beta'])

    def dconv(p, h):
        return conv(p['c2'], conv(p['c1'], h))

    def down(p, h):
        return dconv(p, maxpool2(h))

    def up(p, h1, h2):
        h1 = conv(p['bottom'], h1)            # bottom_conv
        h1 = upsample2_nearest(h1)            # nn.Upsample(scale_factor=2)
        dy = h2.shape[2] - h1.shape[2]
        dx = h2.shape[3] - h1.shape[3]
        h1 = jnp.pad(h1, ((0, 0), (0, 0),
                          (dy // 2, dy - dy // 2),
                          (dx // 2, dx - dx // 2)))
        return dconv(p['conv'], jnp.concatenate([h2, h1], axis=1))

    x1 = dconv(params['inc'], x)
    x2 = down(params['down1'], x1)
    x3 = down(params['down2'], x2)
    x4 = down(params['down3'], x3)
    x5 = down(params['down4'], x4)
    y = up(params['up1'], x5, x4)
    y = up(params['up2'], y, x3)
    y = up(params['up3'], y, x2)
    y = up(params['up4'], y, x1)
    return conv1_fn(y, params['outc']['w'], params['outc']['b'])


# --------------------------- pure-JAX reference -------------------------------

def _conv3x3_bn_relu_ref(x, w, b, gamma, beta, eps=_BN_EPS):
    y = lax.conv_general_dilated(x, w, (1, 1), ((1, 1), (1, 1)),
                                 dimension_numbers=('NCHW', 'OIHW', 'NCHW'))
    y = y + b[None, :, None, None]
    mean = jnp.mean(y, axis=(0, 2, 3), keepdims=True)
    var = jnp.mean(jnp.square(y - mean), axis=(0, 2, 3), keepdims=True)
    yn = (y - mean) * lax.rsqrt(var + eps) * gamma[None, :, None, None] \
        + beta[None, :, None, None]
    return jnp.maximum(yn, 0.0)


def _conv1x1_ref(x, w, b):
    y = lax.conv_general_dilated(x, w, (1, 1), ((0, 0), (0, 0)),
                                 dimension_numbers=('NCHW', 'OIHW', 'NCHW'))
    return y + b[None, :, None, None]


# ------------------------------ parameters -----------------------------------

def _conv_params(key, cin, cout):
    kw, kb, kg, kbt = jax.random.split(key, 4)
    std = (9.0 * cin) ** -0.5
    return dict(
        w=std * jax.random.normal(kw, (cout, cin, 3, 3), jnp.float32),
        b=0.1 * jax.random.normal(kb, (cout,), jnp.float32),
        gamma=1.0 + 0.1 * jax.random.normal(kg, (cout,), jnp.float32),
        beta=0.1 * jax.random.normal(kbt, (cout,), jnp.float32))


def init_discriminator_params(key, input_channels, n_filters, n_classes):
    keys = iter(jax.random.split(key, 32))

    def dconv(cin, cout):
        return dict(c1=_conv_params(next(keys), cin, cout),
                    c2=_conv_params(next(keys), cout, cout))

    def upblk(cin, cout):
        return dict(bottom=_conv_params(next(keys), cin, cout),
                    conv=dconv(cin, cout))

    nf = n_filters
    params = dict(
        inc=dconv(input_channels, nf),
        down1=dconv(nf, 2 * nf), down2=dconv(2 * nf, 4 * nf),
        down3=dconv(4 * nf, 8 * nf), down4=dconv(8 * nf, 16 * nf),
        up1=upblk(16 * nf, 8 * nf), up2=upblk(8 * nf, 4 * nf),
        up3=upblk(4 * nf, 2 * nf), up4=upblk(2 * nf, nf))
    kw, kb = jax.random.split(next(keys))
    params['outc'] = dict(
        w=(1.0 / nf ** 0.5) * jax.random.normal(kw, (n_classes, nf, 1, 1),
                                                jnp.float32),
        b=0.1 * jax.random.normal(kb, (n_classes,), jnp.float32))
    return params


# --------------------------------- main ---------------------------------------

if __name__ == "__main__":
    # Small shapes consistent with the module: 4 down/up stages need spatial>=32
    # to stay non-degenerate; n_filters=4, 3 input channels, 2 classes.
    N, IN_CH, NF, N_CLASSES, H, W = 2, 3, 4, 2, 32, 32

    root = jax.random.PRNGKey(0)
    kparams, kx = jax.random.split(root)
    params = init_discriminator_params(kparams, IN_CH, NF, N_CLASSES)
    x = jax.random.normal(kx, (N, IN_CH, H, W), jnp.float32)

    logits = discriminator_forward(params, x, conv3x3_bn_relu, conv1x1_bias)
    logits = jax.block_until_ready(logits)
    assert logits.shape == (N, N_CLASSES, H, W), logits.shape

    ref = jax.block_until_ready(
        discriminator_forward(params, x, _conv3x3_bn_relu_ref, _conv1x1_ref))
    max_err = float(jnp.max(jnp.abs(logits - ref)))
    if not jnp.allclose(logits, ref, atol=2e-3, rtol=2e-3):
        raise AssertionError(
            f"Pallas output does not match reference (max abs err {max_err:.3e})")
    print("KERNEL_OK")
</pallas_src>

<mosaic_0001>
module attributes {stable_mosaic.version = 11 : i64} {
  func.func @_matmul_stats_kernel(%arg0: i32, %arg1: memref<512x32xf32, #tpu.memory_space<vmem>>, %arg2: memref<32x128xf32, #tpu.memory_space<vmem>>, %arg3: memref<512x128xf32, #tpu.memory_space<vmem>>, %arg4: memref<1x128xf32, #tpu.memory_space<vmem>>, %arg5: memref<1x128xf32, #tpu.memory_space<vmem>>) attributes {dimension_semantics = [#tpu.dimension_semantics<arbitrary>], iteration_bounds = array<i64: 4>, scalar_prefetch = 0 : i64, scratch_operands = 0 : i64, tpu.core_type = #tpu.core_type<tc>, window_params = [{transform_indices = @transform_0, window_bounds = array<i64: 512, 32>}, {pipeline_mode = #tpu.pipeline_mode<synchronous>, transform_indices = @transform_1, window_bounds = array<i64: 32, 128>}, {transform_indices = @transform_2, window_bounds = array<i64: 512, 128>}, {pipeline_mode = #tpu.pipeline_mode<synchronous>, transform_indices = @transform_3, window_bounds = array<i64: 1, 128>}, {pipeline_mode = #tpu.pipeline_mode<synchronous>, transform_indices = @transform_4, window_bounds = array<i64: 1, 128>}]} {
    %c0 = arith.constant 0 : index
    %c0_0 = arith.constant 0 : index
    %0 = vector.load %arg1[%c0, %c0_0] : memref<512x32xf32, #tpu.memory_space<vmem>>, vector<512x32xf32>
    %c0_1 = arith.constant 0 : index
    %c0_2 = arith.constant 0 : index
    %1 = vector.load %arg2[%c0_1, %c0_2] : memref<32x128xf32, #tpu.memory_space<vmem>>, vector<32x128xf32>
    %cst = arith.constant dense<0.000000e+00> : vector<512x128xf32>
    %2 = tpu.matmul %0, %1, %cst {dimension_numbers = #tpu.dot_dimension_numbers<[1], [0], [0], [1], [0, 0, 1, 1], [], []>} : vector<512x32xf32>, vector<32x128xf32>, vector<512x128xf32> -> vector<512x128xf32>
    %c0_3 = arith.constant 0 : index
    %c0_4 = arith.constant 0 : index
    %3 = vector.load %arg3[%c0_3, %c0_4] : memref<512x128xf32, #tpu.memory_space<vmem>>, vector<512x128xf32>
    tpu.vector_store %arg3[%c0_3, %c0_4], %2 {strides = array<i32>} : memref<512x128xf32, #tpu.memory_space<vmem>>, vector<512x128xf32>,
    %c0_i32 = arith.constant 0 : i32
    %4 = arith.cmpi eq, %arg0, %c0_i32 : i32
    %5 = arith.extui %4 : i1 to i32
    %c0_i32_5 = arith.constant 0 : i32
    %6 = arith.cmpi ne, %5, %c0_i32_5 : i32
    scf.if %6 {
      %cst_16 = arith.constant 0.000000e+00 : f32
      %18 = vector.broadcast %cst_16 : f32 to vector<1x128xf32>
      %c0_17 = arith.constant 0 : index
      %c0_18 = arith.constant 0 : index
      %19 = vector.load %arg4[%c0_17, %c0_18] : memref<1x128xf32, #tpu.memory_space<vmem>>, vector<1x128xf32>
      tpu.vector_store %arg4[%c0_17, %c0_18], %18 {strides = array<i32>} : memref<1x128xf32, #tpu.memory_space<vmem>>, vector<1x128xf32>,
      %cst_19 = arith.constant 0.000000e+00 : f32
      %20 = vector.broadcast %cst_19 : f32 to vector<1x128xf32>
      %c0_20 = arith.constant 0 : index
      %c0_21 = arith.constant 0 : index
      %21 = vector.load %arg5[%c0_20, %c0_21] : memref<1x128xf32, #tpu.memory_space<vmem>>, vector<1x128xf32>
      tpu.vector_store %arg5[%c0_20, %c0_21], %20 {strides = array<i32>} : memref<1x128xf32, #tpu.memory_space<vmem>>, vector<1x128xf32>,
    } else {
    }
    %c0_6 = arith.constant 0 : index
    %c0_7 = arith.constant 0 : index
    %7 = vector.load %arg4[%c0_6, %c0_7] : memref<1x128xf32, #tpu.memory_space<vmem>>, vector<1x128xf32>
    %cst_8 = arith.constant dense<0.000000e+00> : vector<128xf32>
    %8 = vector.multi_reduction <add>, %2, %cst_8 [0] : vector<512x128xf32> to vector<128xf32>
    %9 = vector.shape_cast %8 : vector<128xf32> to vector<1x128xf32>
    %10 = arith.addf %7, %9 : vector<1x128xf32>
    %c0_9 = arith.constant 0 : index
    %c0_10 = arith.constant 0 : index
    %11 = vector.load %arg4[%c0_9, %c0_10] : memref<1x128xf32, #tpu.memory_space<vmem>>, vector<1x128xf32>
    tpu.vector_store %arg4[%c0_9, %c0_10], %10 {strides = array<i32>} : memref<1x128xf32, #tpu.memory_space<vmem>>, vector<1x128xf32>,
    %c0_11 = arith.constant 0 : index
    %c0_12 = arith.constant 0 : index
    %12 = vector.load %arg5[%c0_11, %c0_12] : memref<1x128xf32, #tpu.memory_space<vmem>>, vector<1x128xf32>
    %13 = arith.mulf %2, %2 : vector<512x128xf32>
    %cst_13 = arith.constant dense<0.000000e+00> : vector<128xf32>
    %14 = vector.multi_reduction <add>, %13, %cst_13 [0] : vector<512x128xf32> to vector<128xf32>
    %15 = vector.shape_cast %14 : vector<128xf32> to vector<1x128xf32>
    %16 = arith.addf %12, %15 : vector<1x128xf32>
    %c0_14 = arith.constant 0 : index
    %c0_15 = arith.constant 0 : index
    %17 = vector.load %arg5[%c0_14, %c0_15] : memref<1x128xf32, #tpu.memory_space<vmem>>, vector<1x128xf32>
    tpu.vector_store %arg5[%c0_14, %c0_15], %16 {strides = array<i32>} : memref<1x128xf32, #tpu.memory_space<vmem>>, vector<1x128xf32>,
    return
  }
  func.func @transform_0(%arg0: i32) -> (i32, i32) {
    %c0_i32 = arith.constant 0 : i32
    %c0_i32_0 = arith.constant 0 : i32
    return %arg0, %c0_i32 : i32, i32
  }
  func.func @transform_1(%arg0: i32) -> (i32, i32) {
    %c0_i32 = arith.constant 0 : i32
    %c0_i32_0 = arith.constant 0 : i32
    %c0_i32_1 = arith.constant 0 : i32
    return %c0_i32, %c0_i32_0 : i32, i32
  }
  func.func @transform_2(%arg0: i32) -> (i32, i32) {
    %c0_i32 = arith.constant 0 : i32
    %c0_i32_0 = arith.constant 0 : i32
    return %arg0, %c0_i32 : i32, i32
  }
  func.func @transform_3(%arg0: i32) -> (i32, i32) {
    %c0_i32 = arith.constant 0 : i32
    %c0_i32_0 = arith.constant 0 : i32
    %c0_i32_1 = arith.constant 0 : i32
    return %c0_i32, %c0_i32_0 : i32, i32
  }
  func.func @transform_4(%arg0: i32) -> (i32, i32) {
    %c0_i32 = arith.constant 0 : i32
    %c0_i32_0 = arith.constant 0 : i32
    %c0_i32_1 = arith.constant 0 : i32
    return %c0_i32, %c0_i32_0 : i32, i32
  }
}

</mosaic_0001>

<bundles_post_ra>
// kernel: tpu_custom_call.1
= control target key start
LH: loop header
LB: loop body
LE: loop exit
PB: predicated region body
PF: predicated region fallthrough
CT: control target
= control target key end

     0   :  { %10 = vsyncpa [#allocation3], 0  ;;  %s2420_s0 = inlined_call_operand.vmem [shape: f32[2048,32], index: 0, kind: input, shape index: {}]   ;;  %s2421_s1 = inlined_call_operand.vmem [shape: f32[32,128], index: 1, kind: input, shape index: {}]   ;;  %s2422_s2 = inlined_call_operand.hbm [shape: f32[2048,128], index: 2, kind: output, shape index: {0}]   ;;  %s2423_s3 = inlined_call_operand.hbm [shape: f32[1,128], index: 3, kind: output, shape index: {1}]   ;;  %s2424_s4 = inlined_call_operand.hbm [shape: f32[1,128], index: 4, kind: output, shape index: {2}]  }
   0x1   :  { %12 = vsyncpa [#allocation3 + $0x1], 0 }
   0x2   :  { %13 = vsyncpa [#allocation5], 0  ;;  %s1701_s15 = smov 0   ;;  %s1703_s16 = smov 0  }
   0x3   :  { %s1705_s17 = smov 0   ;;  %s1707_s18 = smov 0  }
   0x4 LB: > { %s1722_s19 = sadd.s32 4294967295, %s1668_s18   ;;  %s1238_s20 = sadd.s32 4294967294, %s1668_s18   ;;  %s1668_s18 = sphi %s1707_s18, %s2470_s18   ;;  %s1664_s17 = sphi %s1705_s17, %s2469_s17   ;;  %s1660_s16 = sphi %s1703_s16, %s2468_s16   ;;  %s1656_s15 = sphi %s1701_s15, %s2467_s15  }
   0x5   : > { %s1726_s21 = sadd.s32 1, %s1668_s18   ;;  %s73_s22 = sadd.s32 1, %s1664_s17 }
   0x6   : > { %s70_s23 = ssub.s32 %s1668_s18, %s1726_s21  ;;  %p83_p0 = scmp.ne.s32.totalorder %s1664_s17, %s1660_s16 }
   0x7   : > { %p71_p1 = scmp.eq.s32.totalorder %s70_s23, 0  ;;  %p84_p2 = scmp.eq.s32.totalorder %s1722_s19, 3 }
   0x8   : > { %p89_p3 = scmp.ne.s32.totalorder %s1660_s16, %s1656_s15  ;;  %p90_p4 = scmp.eq.s32.totalorder %s1238_s20, 3 }
   0x9   : > { %s1737_s24 = scalar_select %p71_p1, %s1664_s17, %s73_s22  }
   0xa   : > { %p1741_p5 = por %p84_p2, %p83_p0  ;;  %p1745_p6 = por %p90_p4, %p89_p3 }
   0xb   : > { %p1241_p7 = scmp.ge.s32.totalorder %s1668_s18, 1  ;;  %p162_p8 = scmp.lt.s32.totalorder %s1668_s18, 5 }
   0xd   : > { %p163_p9 = pnand %p1241_p7, %p162_p8 }
   0xf   : > { %166 = sbr.rel (%p163_p9) target bundleno = 462 (0x1ce), region = 28 }
  0x14   : > { %v262_v0 = vld [vmem:[%s2421_s1 + $0x18] sm:$0xff]  ;;  %v261_v1 = vld [vmem:[%s2421_s1 + $0x10] sm:$0xff]  ;;  %s1243_s5 = sshll.u32 %s1722_s19, 6  ;;  %v260_v2 = vld [vmem:[%s2421_s1 + $0x8] sm:$0xff]  ;;  %vm263_vm0 = vcmask 261120   ;;  %s181_s14 = sand.u32 1, %s1660_s16  }
  0x15   : > { %1388 = vmatprep.subr.mxu0 %v262_v0  ;;  %1492 = vmatprep.subr.mxu1 %v262_v0  ;;  %p189_p10 = scmp.lt.s32.totalorder %s1243_s5, 255  ;;  %v259_v3 = vld [vmem:[%s2421_s1] sm:$0xff]  ;;  %s1242_s20 = sshll.u32 %s181_s14, 9 }
  0x16   : > { %1389 = vmatpush3.msra.mxu0 %v262_v0  ;;  %1496 = vmatpush3.msra.mxu1 %v262_v0  ;;  %s1904_s22 = scalar_lea.vmem [#allocation2], %s1242_s20  ;;  %p1309_p11 = scmp.ne.s32.totalorder %s1722_s19, 0 }
  0x17   : > { %1390 = vmatprep.subr.mxu0 %v261_v1  ;;  %1493 = vmatprep.subr.mxu1 %v261_v1  ;;  %s2472_s5 = smov (!%p189_p10, %s1243_s5), 255 }
  0x18   : > { %1391 = vmatpush3.msra.mxu0 %v261_v1  ;;  %1497 = vmatpush3.msra.mxu1 %v261_v1  ;;  %s1244_s10 = sshll.u32 %s2472_s5, 3 }
  0x19   : > { %1392 = vmatprep.subr.mxu0 %v260_v2  ;;  %1494 = vmatprep.subr.mxu1 %v260_v2  ;;  %s1767_s13 = scalar_lea.vmem %s2420_s0, %s1244_s10 }
  0x1a   : > { %1393 = vmatpush3.msra.mxu0 %v260_v2  ;;  %1498 = vmatpush3.msra.mxu1 %v260_v2  ;;  %v195_v4 = vld [vmem:[%s1767_s13] sm:$0xff]  ;;  %v196_v6 = vld [vmem:[%s1767_s13 + $0x8] sm:$0xff]  ;;  %v197_v8 = vld [vmem:[%s1767_s13 + $0x10] sm:$0xff] }
  0x1b   : > { %1394 = vmatprep.subr.mxu0 %v259_v3  ;;  %1495 = vmatprep.subr.mxu1 %v259_v3  ;;  %v227_v5 = vld [vmem:[%s1767_s13 + $0x100] sm:$0xff]  ;;  %v228_v7 = vld [vmem:[%s1767_s13 + $0x108] sm:$0xff]  ;;  %v229_v9 = vld [vmem:[%s1767_s13 + $0x110] sm:$0xff] }
  0x1c   : > { %1395 = vmatpush3.msra.mxu0 %v259_v3  ;;  %1499 = vmatpush3.msra.mxu1 %v259_v3  ;;  %v198_v10 = vld [vmem:[%s1767_s13 + $0x18] sm:$0xff]  ;;  %v199_v12 = vld [vmem:[%s1767_s13 + $0x20] sm:$0xff]  ;;  %v200_v14 = vld [vmem:[%s1767_s13 + $0x28] sm:$0xff] }
  0x1d   : > { %1396 = vmatprep.mubr.msk.f32.mxu0 %vm263_vm0, %v195_v4  ;;  %1444 = vmatprep.mubr.msk.f32.mxu1 %vm263_vm0, %v227_v5  ;;  %v230_v11 = vld [vmem:[%s1767_s13 + $0x118] sm:$0xff]  ;;  %v231_v13 = vld [vmem:[%s1767_s13 + $0x120] sm:$0xff]  ;;  %v232_v15 = vld [vmem:[%s1767_s13 + $0x128] sm:$0xff] }
  0x1e   : > { %1397 = vmatmul.mubr.msk.f32.vlgmr.msra.gmra.mxu0 %vm263_vm0, %v196_v6  ;;  %1445 = vmatmul.mubr.msk.f32.vlgmr.msra.gmra.mxu1 %vm263_vm0, %v228_v7  ;;  %v201_v16 = vld [vmem:[%s1767_s13 + $0x30] sm:$0xff]  ;;  %v202_v18 = vld [vmem:[%s1767_s13 + $0x38] sm:$0xff]  ;;  %v203_v20 = vld [vmem:[%s1767_s13 + $0x40] sm:$0xff] }
  0x1f   : > { %1399 = vmatprep.mubr.msk.f32.mxu0 %vm263_vm0, %v197_v8  ;;  %1447 = vmatprep.mubr.msk.f32.mxu1 %vm263_vm0, %v229_v9  ;;  %v233_v17 = vld [vmem:[%s1767_s13 + $0x130] sm:$0xff]  ;;  %v234_v19 = vld [vmem:[%s1767_s13 + $0x138] sm:$0xff]  ;;  %v235_v21 = vld [vmem:[%s1767_s13 + $0x140] sm:$0xff] }
  0x20   : > { %v204_v22 = vld [vmem:[%s1767_s13 + $0x48] sm:$0xff]  ;;  %v205_v24 = vld [vmem:[%s1767_s13 + $0x50] sm:$0xff]  ;;  %v206_v26 = vld [vmem:[%s1767_s13 + $0x58] sm:$0xff] }
  0x21   : > { %v236_v23 = vld [vmem:[%s1767_s13 + $0x148] sm:$0xff]  ;;  %v237_v25 = vld [vmem:[%s1767_s13 + $0x150] sm:$0xff]  ;;  %v238_v27 = vld [vmem:[%s1767_s13 + $0x158] sm:$0xff] }
  0x22   : > { %1400 = vmatmul.mubr.msk.f32.gmra.mxu0 %vm263_vm0, %v198_v10  ;;  %1448 = vmatmul.mubr.msk.f32.gmra.mxu1 %vm263_vm0, %v230_v11  ;;  %v207_v28 = vld [vmem:[%s1767_s13 + $0x60] sm:$0xff]  ;;  %v208_v30 = vld [vmem:[%s1767_s13 + $0x68] sm:$0xff]  ;;  %v209_v32 = vld [vmem:[%s1767_s13 + $0x70] sm:$0xff] }
  0x23   : > { %1402 = vmatprep.mubr.msk.f32.mxu0 %vm263_vm0, %v199_v12  ;;  %1450 = vmatprep.mubr.msk.f32.mxu1 %vm263_vm0, %v231_v13  ;;  %v239_v29 = vld [vmem:[%s1767_s13 + $0x160] sm:$0xff]  ;;  %v240_v31 = vld [vmem:[%s1767_s13 + $0x168] sm:$0xff]  ;;  %v241_v33 = vld [vmem:[%s1767_s13 + $0x170] sm:$0xff] }
  0x24   : > { %v210_v34 = vld [vmem:[%s1767_s13 + $0x78] sm:$0xff]  ;;  %v211_v36 = vld [vmem:[%s1767_s13 + $0x80] sm:$0xff]  ;;  %v212_v38 = vld [vmem:[%s1767_s13 + $0x88] sm:$0xff] }
  0x25   : > { %v242_v35 = vld [vmem:[%s1767_s13 + $0x178] sm:$0xff]  ;;  %v243_v37 = vld [vmem:[%s1767_s13 + $0x180] sm:$0xff]  ;;  %v244_v39 = vld [vmem:[%s1767_s13 + $0x188] sm:$0xff] }
  0x26   : > { %1403 = vmatmul.mubr.msk.f32.gmra.mxu0 %vm263_vm0, %v200_v14  ;;  %1451 = vmatmul.mubr.msk.f32.gmra.mxu1 %vm263_vm0, %v232_v15  ;;  %v213_v40 = vld [vmem:[%s1767_s13 + $0x90] sm:$0xff]  ;;  %v214_v42 = vld [vmem:[%s1767_s13 + $0x98] sm:$0xff]  ;;  %v215_v44 = vld [vmem:[%s1767_s13 + $0xa0] sm:$0xff] }
  0x27   : > { %1405 = vmatprep.mubr.msk.f32.mxu0 %vm263_vm0, %v201_v16  ;;  %1453 = vmatprep.mubr.msk.f32.mxu1 %vm263_vm0, %v233_v17  ;;  %v245_v41 = vld [vmem:[%s1767_s13 + $0x190] sm:$0xff]  ;;  %v246_v43 = vld [vmem:[%s1767_s13 + $0x198] sm:$0xff]  ;;  %v247_v45 = vld [vmem:[%s1767_s13 + $0x1a0] sm:$0xff] }
  0x28   : > { %v216_v46 = vld [vmem:[%s1767_s13 + $0xa8] sm:$0xff]  ;;  %v217_v48 = vld [vmem:[%s1767_s13 + $0xb0] sm:$0xff]  ;;  %v218_v50 = vld [vmem:[%s1767_s13 + $0xb8] sm:$0xff] }
  0x29   : > { %v248_v47 = vld [vmem:[%s1767_s13 + $0x1a8] sm:$0xff]  ;;  %v249_v49 = vld [vmem:[%s1767_s13 + $0x1b0] sm:$0xff]  ;;  %v250_v51 = vld [vmem:[%s1767_s13 + $0x1b8] sm:$0xff] }
  0x2a   : > { %1406 = vmatmul.mubr.msk.f32.gmra.mxu0 %vm263_vm0, %v202_v18  ;;  %1454 = vmatmul.mubr.msk.f32.gmra.mxu1 %vm263_vm0, %v234_v19  ;;  %v219_v52 = vld [vmem:[%s1767_s13 + $0xc0] sm:$0xff]  ;;  %v220_v54 = vld [vmem:[%s1767_s13 + $0xc8] sm:$0xff]  ;;  %v221_v56 = vld [vmem:[%s1767_s13 + $0xd0] sm:$0xff] }
  0x2b   : > { %1408 = vmatprep.mubr.msk.f32.mxu0 %vm263_vm0, %v203_v20  ;;  %1456 = vmatprep.mubr.msk.f32.mxu1 %vm263_vm0, %v235_v21  ;;  %v251_v53 = vld [vmem:[%s1767_s13 + $0x1c0] sm:$0xff]  ;;  %v252_v55 = vld [vmem:[%s1767_s13 + $0x1c8] sm:$0xff]  ;;  %v253_v57 = vld [vmem:[%s1767_s13 + $0x1d0] sm:$0xff] }
  0x2c   : > { %v222_v58 = vld [vmem:[%s1767_s13 + $0xd8] sm:$0xff]  ;;  %v223_v60 = vld [vmem:[%s1767_s13 + $0xe0] sm:$0xff]  ;;  %v224_v62 = vld [vmem:[%s1767_s13 + $0xe8] sm:$0xff] }
  0x2d   : > { %v254_v59 = vld [vmem:[%s1767_s13 + $0x1d8] sm:$0xff]  ;;  %v255_v61 = vld [vmem:[%s1767_s13 + $0x1e0] sm:$0xff]  ;;  %v256_v63 = vld [vmem:[%s1767_s13 + $0x1e8] sm:$0xff] }
  0x2e   : > { %1409 = vmatmul.mubr.msk.f32.gmra.mxu0 %vm263_vm0, %v204_v22  ;;  %1457 = vmatmul.mubr.msk.f32.gmra.mxu1 %vm263_vm0, %v236_v23  ;;  %v225_v0 = vld [vmem:[%s1767_s13 + $0xf0] sm:$0xff]  ;;  %v226_v2 = vld [vmem:[%s1767_s13 + $0xf8] sm:$0xff] }
  0x2f   : > { %1411 = vmatprep.mubr.msk.f32.mxu0 %vm263_vm0, %v205_v24  ;;  %1459 = vmatprep.mubr.msk.f32.mxu1 %vm263_vm0, %v237_v25  ;;  %v257_v1 = vld [vmem:[%s1767_s13 + $0x1f0] sm:$0xff]  ;;  %v258_v3 = vld [vmem:[%s1767_s13 + $0x1f8] sm:$0xff] }
  0x32   : > { %1412 = vmatmul.mubr.msk.f32.gmra.mxu0 %vm263_vm0, %v206_v26  ;;  %1460 = vmatmul.mubr.msk.f32.gmra.mxu1 %vm263_vm0, %v238_v27 }
  0x33   : > { %1414 = vmatprep.mubr.msk.f32.mxu0 %vm263_vm0, %v207_v28  ;;  %1462 = vmatprep.mubr.msk.f32.mxu1 %vm263_vm0, %v239_v29 }
  0x36   : > { %1415 = vmatmul.mubr.msk.f32.gmra.mxu0 %vm263_vm0, %v208_v30  ;;  %1463 = vmatmul.mubr.msk.f32.gmra.mxu1 %vm263_vm0, %v240_v31 }
  0x37   : > { %1417 = vmatprep.mubr.msk.f32.mxu0 %vm263_vm0, %v209_v32  ;;  %1465 = vmatprep.mubr.msk.f32.mxu1 %vm263_vm0, %v241_v33 }
  0x3a   : > { %1418 = vmatmul.mubr.msk.f32.gmra.mxu0 %vm263_vm0, %v210_v34  ;;  %1466 = vmatmul.mubr.msk.f32.gmra.mxu1 %vm263_vm0, %v242_v35 }
  0x3b   : > { %1420 = vmatprep.mubr.msk.f32.mxu0 %vm263_vm0, %v211_v36  ;;  %1468 = vmatprep.mubr.msk.f32.mxu1 %vm263_vm0, %v243_v37 }
  0x3e   : > { %1421 = vmatmul.mubr.msk.f32.gmra.mxu0 %vm263_vm0, %v212_v38  ;;  %1469 = vmatmul.mubr.msk.f32.gmra.mxu1 %vm263_vm0, %v244_v39 }
  0x3f   : > { %1423 = vmatprep.mubr.msk.f32.mxu0 %vm263_vm0, %v213_v40  ;;  %1471 = vmatprep.mubr.msk.f32.mxu1 %vm263_vm0, %v245_v41 }
  0x42   : > { %1424 = vmatmul.mubr.msk.f32.gmra.mxu0 %vm263_vm0, %v214_v42  ;;  %1472 = vmatmul.mubr.msk.f32.gmra.mxu1 %vm263_vm0, %v246_v43 }
  0x43   : > { %1426 = vmatprep.mubr.msk.f32.mxu0 %vm263_vm0, %v215_v44  ;;  %1474 = vmatprep.mubr.msk.f32.mxu1 %vm263_vm0, %v247_v45 }
  0x46   : > { %1427 = vmatmul.mubr.msk.f32.gmra.mxu0 %vm263_vm0, %v216_v46  ;;  %1475 = vmatmul.mubr.msk.f32.gmra.mxu1 %vm263_vm0, %v248_v47 }
  0x47   : > { %1429 = vmatprep.mubr.msk.f32.mxu0 %vm263_vm0, %v217_v48  ;;  %1477 = vmatprep.mubr.msk.f32.mxu1 %vm263_vm0, %v249_v49 }
  0x4a   : > { %1430 = vmatmul.mubr.msk.f32.gmra.mxu0 %vm263_vm0, %v218_v50  ;;  %1478 = vmatmul.mubr.msk.f32.gmra.mxu1 %vm263_vm0, %v250_v51 }
  0x4b   : > { %1432 = vmatprep.mubr.msk.f32.mxu0 %vm263_vm0, %v219_v52  ;;  %1480 = vmatprep.mubr.msk.f32.mxu1 %vm263_vm0, %v251_v53 }
  0x4e   : > { %1433 = vmatmul.mubr.msk.f32.gmra.mxu0 %vm263_vm0, %v220_v54  ;;  %1481 = vmatmul.mubr.msk.f32.gmra.mxu1 %vm263_vm0, %v252_v55 }
  0x4f   : > { %1435 = vmatprep.mubr.msk.f32.mxu0 %vm263_vm0, %v221_v56  ;;  %1483 = vmatprep.mubr.msk.f32.mxu1 %vm263_vm0, %v253_v57 }
  0x52   : > { %1436 = vmatmul.mubr.msk.f32.gmra.mxu0 %vm263_vm0, %v222_v58  ;;  %1484 = vmatmul.mubr.msk.f32.gmra.mxu1 %vm263_vm0, %v254_v59 }
  0x53   : > { %1438 = vmatprep.mubr.msk.f32.mxu0 %vm263_vm0, %v223_v60  ;;  %1486 = vmatprep.mubr.msk.f32.mxu1 %vm263_vm0, %v255_v61 }
  0x56   : > { %1439 = vmatmul.mubr.msk.f32.gmra.mxu0 %vm263_vm0, %v224_v62  ;;  %1487 = vmatmul.mubr.msk.f32.gmra.mxu1 %vm263_vm0, %v256_v63 }
  0x57   : > { %1441 = vmatprep.mubr.msk.f32.mxu0 %vm263_vm0, %v225_v0  ;;  %1489 = vmatprep.mubr.msk.f32.mxu1 %vm263_vm0, %v257_v1 }
  0x5a   : > { %1442 = vmatmul.mubr.msk.f32.gmra.mxu0 %vm263_vm0, %v226_v2  ;;  %1490 = vmatmul.mubr.msk.f32.gmra.mxu1 %vm263_vm0, %v258_v3 }
  0xde   : > { %v1900_v4 = vpop.f32.mrf.mxu0  ;;  %v1902_v5 = vpop.f32.mrf.mxu1 }
  0xdf   : > { %842 = vst [vmem:[%s1904_s22 + $0x8] sm:$0xff] %v1900_v4  ;;  %874 = vst [vmem:[%s1904_s22 + $0x108] sm:$0xff] %v1902_v5 }
  0xe0   : > { %v1910_v6 = vpop.f32.mrf.mxu0  ;;  %v1912_v7 = vpop.f32.mrf.mxu1 }
  0xe1   : > { %841 = vst [vmem:[%s1904_s22] sm:$0xff] %v1910_v6  ;;  %873 = vst [vmem:[%s1904_s22 + $0x100] sm:$0xff] %v1912_v7 }
  0xe2   : > { %v1918_v8 = vpop.f32.mrf.mxu0  ;;  %v1920_v9 = vpop.f32.mrf.mxu1 }
  0xe3   : > { %844 = vst [vmem:[%s1904_s22 + $0x18] sm:$0xff] %v1918_v8  ;;  %876 = vst [vmem:[%s1904_s22 + $0x118] sm:$0xff] %v1920_v9 }
  0xe4   : > { %v1926_v10 = vpop.f32.mrf.mxu0  ;;  %v1928_v11 = vpop.f32.mrf.mxu1 }
  0xe5   : > { %843 = vst [vmem:[%s1904_s22 + $0x10] sm:$0xff] %v1926_v10  ;;  %875 = vst [vmem:[%s1904_s22 + $0x110] sm:$0xff] %v1928_v11 }
  0xe6   : > { %v1934_v12 = vpop.f32.mrf.mxu0  ;;  %v1936_v13 = vpop.f32.mrf.mxu1 }
  0xe7   : > { %846 = vst [vmem:[%s1904_s22 + $0x28] sm:$0xff] %v1934_v12  ;;  %878 = vst [vmem:[%s1904_s22 + $0x128] sm:$0xff] %v1936_v13 }
  0xe8   : > { %v1942_v14 = vpop.f32.mrf.mxu0  ;;  %v1944_v15 = vpop.f32.mrf.mxu1 }
  0xe9   : > { %845 = vst [vmem:[%s1904_s22 + $0x20] sm:$0xff] %v1942_v14  ;;  %877 = vst [vmem:[%s1904_s22 + $0x120] sm:$0xff] %v1944_v15 }
  0xea   : > { %v1950_v16 = vpop.f32.mrf.mxu0  ;;  %v1952_v17 = vpop.f32.mrf.mxu1 }
  0xeb   : > { %848 = vst [vmem:[%s1904_s22 + $0x38] sm:$0xff] %v1950_v16  ;;  %880 = vst [vmem:[%s1904_s22 + $0x138] sm:$0xff] %v1952_v17 }
  0xec   : > { %v1958_v18 = vpop.f32.mrf.mxu0  ;;  %v1960_v19 = vpop.f32.mrf.mxu1 }
  0xed   : > { %847 = vst [vmem:[%s1904_s22 + $0x30] sm:$0xff] %v1958_v18  ;;  %879 = vst [vmem:[%s1904_s22 + $0x130] sm:$0xff] %v1960_v19 }
  0xee   : > { %v1966_v20 = vpop.f32.mrf.mxu0  ;;  %v1968_v21 = vpop.f32.mrf.mxu1 }
  0xef   : > { %850 = vst [vmem:[%s1904_s22 + $0x48] sm:$0xff] %v1966_v20  ;;  %882 = vst [vmem:[%s1904_s22 + $0x148] sm:$0xff] %v1968_v21 }
  0xf0   : > { %v1974_v22 = vpop.f32.mrf.mxu0  ;;  %v1976_v23 = vpop.f32.mrf.mxu1 }
  0xf1   : > { %849 = vst [vmem:[%s1904_s22 + $0x40] sm:$0xff] %v1974_v22  ;;  %881 = vst [vmem:[%s1904_s22 + $0x140] sm:$0xff] %v1976_v23 }
  0xf2   : > { %v1982_v24 = vpop.f32.mrf.mxu0  ;;  %v1984_v25 = vpop.f32.mrf.mxu1 }
  0xf3   : > { %852 = vst [vmem:[%s1904_s22 + $0x58] sm:$0xff] %v1982_v24  ;;  %884 = vst [vmem:[%s1904_s22 + $0x158] sm:$0xff] %v1984_v25 }
  0xf4   : > { %v1990_v26 = vpop.f32.mrf.mxu0  ;;  %v1992_v27 = vpop.f32.mrf.mxu1 }
  0xf5   : > { %851 = vst [vmem:[%s1904_s22 + $0x50] sm:$0xff] %v1990_v26  ;;  %883 = vst [vmem:[%s1904_s22 + $0x150] sm:$0xff] %v1992_v27 }
  0xf6   : > { %v1998_v28 = vpop.f32.mrf.mxu0  ;;  %v2000_v29 = vpop.f32.mrf.mxu1 }
  0xf7   : > { %854 = vst [vmem:[%s1904_s22 + $0x68] sm:$0xff] %v1998_v28  ;;  %886 = vst [vmem:[%s1904_s22 + $0x168] sm:$0xff] %v2000_v29 }
  0xf8   : > { %v2006_v30 = vpop.f32.mrf.mxu0  ;;  %v2008_v31 = vpop.f32.mrf.mxu1 }
  0xf9   : > { %853 = vst [vmem:[%s1904_s22 + $0x60] sm:$0xff] %v2006_v30  ;;  %885 = vst [vmem:[%s1904_s22 + $0x160] sm:$0xff] %v2008_v31 }
  0xfa   : > { %v2014_v32 = vpop.f32.mrf.mxu0  ;;  %v2016_v33 = vpop.f32.mrf.mxu1 }
  0xfb   : > { %856 = vst [vmem:[%s1904_s22 + $0x78] sm:$0xff] %v2014_v32  ;;  %888 = vst [vmem:[%s1904_s22 + $0x178] sm:$0xff] %v2016_v33 }
  0xfc   : > { %v2022_v34 = vpop.f32.mrf.mxu0  ;;  %v2024_v35 = vpop.f32.mrf.mxu1 }
  0xfd   : > { %855 = vst [vmem:[%s1904_s22 + $0x70] sm:$0xff] %v2022_v34  ;;  %887 = vst [vmem:[%s1904_s22 + $0x170] sm:$0xff] %v2024_v35 }
  0xfe   : > { %v2030_v36 = vpop.f32.mrf.mxu0  ;;  %v2032_v37 = vpop.f32.mrf.mxu1 }
  0xff   : > { %858 = vst [vmem:[%s1904_s22 + $0x88] sm:$0xff] %v2030_v36  ;;  %890 = vst [vmem:[%s1904_s22 + $0x188] sm:$0xff] %v2032_v37 }
 0x100   : > { %v2038_v38 = vpop.f32.mrf.mxu0  ;;  %v2040_v39 = vpop.f32.mrf.mxu1 }
 0x101   : > { %857 = vst [vmem:[%s1904_s22 + $0x80] sm:$0xff] %v2038_v38  ;;  %889 = vst [vmem:[%s1904_s22 + $0x180] sm:$0xff] %v2040_v39 }
 0x102   : > { %v2046_v40 = vpop.f32.mrf.mxu0  ;;  %v2048_v41 = vpop.f32.mrf.mxu1 }
 0x103   : > { %860 = vst [vmem:[%s1904_s22 + $0x98] sm:$0xff] %v2046_v40  ;;  %892 = vst [vmem:[%s1904_s22 + $0x198] sm:$0xff] %v2048_v41 }
 0x104   : > { %v2054_v42 = vpop.f32.mrf.mxu0  ;;  %v2056_v43 = vpop.f32.mrf.mxu1 }
 0x105   : > { %859 = vst [vmem:[%s1904_s22 + $0x90] sm:$0xff] %v2054_v42  ;;  %891 = vst [vmem:[%s1904_s22 + $0x190] sm:$0xff] %v2056_v43 }
 0x106   : > { %v2062_v44 = vpop.f32.mrf.mxu0  ;;  %v2064_v45 = vpop.f32.mrf.mxu1 }
 0x107   : > { %862 = vst [vmem:[%s1904_s22 + $0xa8] sm:$0xff] %v2062_v44  ;;  %894 = vst [vmem:[%s1904_s22 + $0x1a8] sm:$0xff] %v2064_v45 }
 0x108   : > { %v2070_v46 = vpop.f32.mrf.mxu0  ;;  %v2072_v47 = vpop.f32.mrf.mxu1 }
 0x109   : > { %861 = vst [vmem:[%s1904_s22 + $0xa0] sm:$0xff] %v2070_v46  ;;  %893 = vst [vmem:[%s1904_s22 + $0x1a0] sm:$0xff] %v2072_v47 }
 0x10a   : > { %v2078_v48 = vpop.f32.mrf.mxu0  ;;  %v2080_v49 = vpop.f32.mrf.mxu1 }
 0x10b   : > { %2447 = vst [vmem:[#allocation9_spill] sm:$0xff] %v2080_v49  ;;  %864 = vst [vmem:[%s1904_s22 + $0xb8] sm:$0xff] %v2078_v48 }
 0x10c   : > { %896 = vst [vmem:[%s1904_s22 + $0x1b8] sm:$0xff] %v2080_v49  ;;  %v2086_v50 = vpop.f32.mrf.mxu0  ;;  %v2088_v51 = vpop.f32.mrf.mxu1 }
 0x10d   : > { %2448 = vst [vmem:[#allocation10_spill] sm:$0xff] %v2088_v51  ;;  %863 = vst [vmem:[%s1904_s22 + $0xb0] sm:$0xff] %v2086_v50 }
 0x10e   : > { %895 = vst [vmem:[%s1904_s22 + $0x1b0] sm:$0xff] %v2088_v51  ;;  %v2094_v52 = vpop.f32.mrf.mxu0  ;;  %v2096_v53 = vpop.f32.mrf.mxu1 }
 0x10f   : > { %2449 = vst [vmem:[#allocation11_spill] sm:$0xff] %v2096_v53  ;;  %866 = vst [vmem:[%s1904_s22 + $0xc8] sm:$0xff] %v2094_v52 }
 0x110   : > { %898 = vst [vmem:[%s1904_s22 + $0x1c8] sm:$0xff] %v2096_v53  ;;  %v2102_v54 = vpop.f32.mrf.mxu0  ;;  %v2104_v55 = vpop.f32.mrf.mxu1 }
 0x111   : > { %2450 = vst [vmem:[#allocation12_spill] sm:$0xff] %v2104_v55  ;;  %865 = vst [vmem:[%s1904_s22 + $0xc0] sm:$0xff] %v2102_v54 }
 0x112   : > { %897 = vst [vmem:[%s1904_s22 + $0x1c0] sm:$0xff] %v2104_v55  ;;  %v2110_v56 = vpop.f32.mrf.mxu0  ;;  %v2112_v57 = vpop.f32.mrf.mxu1 }
 0x113   : > { %2451 = vst [vmem:[#allocation13_spill] sm:$0xff] %v2112_v57  ;;  %868 = vst [vmem:[%s1904_s22 + $0xd8] sm:$0xff] %v2110_v56 }
 0x114   : > { %900 = vst [vmem:[%s1904_s22 + $0x1d8] sm:$0xff] %v2112_v57  ;;  %v2118_v58 = vpop.f32.mrf.mxu0  ;;  %v2120_v59 = vpop.f32.mrf.mxu1 }
 0x115   : > { %2452 = vst [vmem:[#allocation14_spill] sm:$0xff] %v2120_v59  ;;  %867 = vst [vmem:[%s1904_s22 + $0xd0] sm:$0xff] %v2118_v58 }
 0x116   : > { %899 = vst [vmem:[%s1904_s22 + $0x1d0] sm:$0xff] %v2120_v59  ;;  %v2126_v60 = vpop.f32.mrf.mxu0  ;;  %v2128_v61 = vpop.f32.mrf.mxu1 }
 0x117   : > { %2453 = vst [vmem:[#allocation15_spill] sm:$0xff] %v2128_v61  ;;  %870 = vst [vmem:[%s1904_s22 + $0xe8] sm:$0xff] %v2126_v60 }
 0x118   : > { %902 = vst [vmem:[%s1904_s22 + $0x1e8] sm:$0xff] %v2128_v61  ;;  %v2134_v62 = vpop.f32.mrf.mxu0  ;;  %v2136_v63 = vpop.f32.mrf.mxu1 }
 0x119   : > { %2454 = vst [vmem:[#allocation16_spill] sm:$0xff] %v2136_v63  ;;  %869 = vst [vmem:[%s1904_s22 + $0xe0] sm:$0xff] %v2134_v62 }
 0x11a   : > { %901 = vst [vmem:[%s1904_s22 + $0x1e0] sm:$0xff] %v2136_v63  ;;  %v2142_v0 = vpop.f32.mrf.mxu0  ;;  %v2144_v1 = vpop.f32.mrf.mxu1  ;;  %908 = sbr.rel (%p1309_p11) target bundleno = 289 (0x121), region = 32 }
 0x11b   : > { %2455 = vst [vmem:[#allocation17_spill] sm:$0xff] %v2144_v1  ;;  %872 = vst [vmem:[%s1904_s22 + $0xf8] sm:$0xff] %v2142_v0 }
 0x11c   : > { %904 = vst [vmem:[%s1904_s22 + $0x1f8] sm:$0xff] %v2144_v1  ;;  %v2150_v2 = vpop.f32.mrf.mxu0  ;;  %v2152_v3 = vpop.f32.mrf.mxu1 }
 0x11d   : > { %2456 = vst [vmem:[#allocation18_spill] sm:$0xff] %v2152_v3  ;;  %871 = vst [vmem:[%s1904_s22 + $0xf0] sm:$0xff] %v2150_v2 }
 0x11e   : > { %903 = vst [vmem:[%s1904_s22 + $0x1f0] sm:$0xff] %v2152_v3 }
 0x11f   : > { %v1670_v61 = vmov 0.0  }
 0x120   : > { %909 = vst [vmem:[#allocation4] sm:$0x1] %v1670_v61  ;;  %910 = vst [vmem:[#allocation6] sm:$0x1] %v1670_v61 }
 0x121 PF: > { %v912_v63 = vadd.f32 %v1900_v4, %v1910_v6  ;;  %v984_v61 = vmul.f32 %v1910_v6, %v1910_v6  ;;  %v985_v51 = vmul.f32 %v1900_v4, %v1900_v4  ;;  %v988_v6 = vmul.f32 %v1942_v14, %v1942_v14  ;;  %s1319_s23 = sshll.u32 %s1722_s19, 13  ;;  %s1133_s30 = sshll.u32 %s1904_s22, 4  ;;  %s2206_s30 = int_to_ptr.vmem [resolvable:$true] %s1133_s30 }
 0x122   : > { %s2200_s29 = scalar_lea.hbm %s2422_s2, %s1319_s23  ;;  %s2210_s5 = scalar_lea.sflag [#allocation3], %s181_s14 }
 0x123   : > { %v913_v1 = vadd.f32 %v912_v63, %v1926_v10  ;;  %s1556_s6 = scalar_lea.vmem %s2206_s30, 8192  ;;  %s1671_s7 = smov [#allocation2]  }
 0x124   : > { %p1557_p12 = scmp.ne.s32.totalorder %s2206_s30, %s1556_s6  ;;  %s1560_s8 = sshll.u32 %s1671_s7, 4  ;;  %s1561_s8 = int_to_ptr.vmem [resolvable:$false] %s1560_s8 }
 0x125   : > { %v914_v57 = vadd.f32 %v1918_v8, %v913_v1  ;;  %v986_v1 = vmul.f32 %v1926_v10, %v1926_v10  ;;  %s1562_s9 = scalar_lea.vmem %s1561_s8, 16384  ;;  %p1563_p1 = scmp.lt.s32.totalorder %s2206_s30, %s1561_s8 }
 0x126   : > { %p1558_p13 = pnand %p1557_p12, %p1741_p5  ;;  %p1564_p3 = scmp.lt.s32.totalorder %s1562_s9, %s1556_s6 }
 0x127   : > { %v915_v59 = vadd.f32 %v914_v57, %v1942_v14  ;;  %v991_v14 = vmul.f32 %v1950_v16, %v1950_v16 }
 0x128   : > { %p1559_p0 = pneg %p1558_p13  ;;  %p1565_p4 = por %p1564_p3, %p1563_p1 }
 0x129   : > { %v916_v53 = vadd.f32 %v1934_v12, %v915_v59  ;;  %v1048_v59 = vadd.f32 %v985_v51, %v984_v61 }
 0x12a   : > { %p1566_p7 = pnand %p1565_p4, %p1559_p0 }
 0x12b   : > { %v917_v3 = vadd.f32 %v916_v53, %v1958_v18  ;;  %v987_v53 = vmul.f32 %v1918_v8, %v1918_v8  ;;  %v990_v8 = vmul.f32 %v1958_v18, %v1958_v18  ;;  %v993_v18 = vmul.f32 %v1966_v20, %v1966_v20 }
 0x12d   : > { %v918_v55 = vadd.f32 %v1950_v16, %v917_v3  ;;  %v1049_v3 = vadd.f32 %v1048_v59, %v986_v1 }
 0x12f   : > { %v919_v49 = vadd.f32 %v918_v55, %v1974_v22  ;;  %v1050_v10 = vadd.f32 %v1049_v3, %v987_v53 }
 0x131   : > { %v920_v63 = vadd.f32 %v1966_v20, %v919_v49  ;;  %v989_v49 = vmul.f32 %v1934_v12, %v1934_v12  ;;  %v1051_v51 = vadd.f32 %v1050_v10, %v988_v6  ;;  %v992_v12 = vmul.f32 %v1974_v22, %v1974_v22 }
 0x132   : > { %v994_v6 = vmul.f32 %v1990_v26, %v1990_v26 }
 0x133   : > { %v921_v57 = vadd.f32 %v920_v63, %v1990_v26  ;;  %v1052_v1 = vadd.f32 %v1051_v51, %v989_v49 }
 0x135   : > { %v922_v55 = vadd.f32 %v1982_v24, %v921_v57  ;;  %v1053_v53 = vadd.f32 %v1052_v1, %v990_v8 }
 0x137   : > { %v923_v4 = vadd.f32 %v922_v55, %v2006_v30  ;;  %v1054_v55 = vadd.f32 %v1053_v53, %v991_v14 }
 0x139   : > { %v924_v63 = vadd.f32 %v1998_v28, %v923_v4  ;;  %v1055_v22 = vadd.f32 %v1054_v55, %v992_v12 }
 0x13b   : > { %v925_v61 = vadd.f32 %v924_v63, %v2022_v34 }
 0x13d   : > { %v926_v57 = vadd.f32 %v2014_v32, %v925_v61 }
 0x13f   : > { %v927_v59 = vadd.f32 %v926_v57, %v2038_v38 }
 0x141   : > { %v928_v16 = vadd.f32 %v2030_v36, %v927_v59 }
 0x142   : > { %1569 = shalt.err (!%p1566_p7)
}
 0x143   : > { %s1570_s10 = scalar_lea.hbm %s2200_s29, 8192  ;;  %s1574_s13 = scalar_lea.hbm %s2422_s2, 32768 }
 0x144   : > { %p1571_p8 = scmp.ne.s32.totalorder %s2200_s29, %s1570_s10  ;;  %p1575_p11 = scmp.lt.s32.totalorder %s2200_s29, %s2422_s2 }
 0x145   : > { %p1576_p12 = scmp.lt.s32.totalorder %s1574_s13, %s1570_s10 }
 0x146   : > { %p1572_p9 = pnand %p1571_p8, %p1741_p5 }
 0x147   : > { %p1577_p13 = por %p1576_p12, %p1575_p11 }
 0x148   : > { %p1573_p10 = pneg %p1572_p9 }
 0x14a   : > { %p1578_p0 = pnand %p1577_p13, %p1573_p10 }
 0x14c   : > { %1581 = shalt.err (!%p1578_p0)
}
 0x14d   : > { %s1672_s22 = smov 128   ;;  %s1673_s23 = smov 8   ;;  %v929_v20 = vadd.f32 %v928_v16, %v2054_v42  ;;  %v995_v26 = vmul.f32 %v1982_v24, %v1982_v24  ;;  %v1056_v3 = vadd.f32 %v1055_v22, %v993_v18  ;;  %v996_v49 = vmul.f32 %v2006_v30, %v2006_v30 }
 0x14e   : > { %1500 = dma.vmem_to_hbm [thread:$0]  (%p1741_p5), %s2206_s30, 8192, %s2200_s29, %s2210_s5, %s1672_s22, %s1672_s22, %s1673_s23   ;;  %v997_v8 = vmul.f32 %v1998_v28, %v1998_v28  ;;  %v998_v14 = vmul.f32 %v2022_v34, %v2022_v34  ;;  %v999_v57 = vmul.f32 %v2014_v32, %v2014_v32  ;;  %v1000_v53 = vmul.f32 %v2038_v38, %v2038_v38 }
 0x14f   : > { %v930_v4 = vadd.f32 %v2046_v40, %v929_v20  ;;  %v1057_v10 = vadd.f32 %v1056_v3, %v994_v6  ;;  %v1001_v18 = vmul.f32 %v2030_v36, %v2030_v36  ;;  %v1002_v16 = vmul.f32 %v2054_v42, %v2054_v42  ;;  %s1674_s25 = smov [#allocation4]  }
 0x150   : > { %v1003_v22 = vmul.f32 %v2046_v40, %v2046_v40  ;;  %s1147_s27 = sshll.u32 %s1674_s25, 4  ;;  %s1148_s27 = int_to_ptr.vmem [resolvable:$true] %s1147_s27 }
 0x151   : > { %v931_v63 = vadd.f32 %v930_v4, %v2070_v46  ;;  %v1058_v51 = vadd.f32 %v1057_v10, %v995_v26  ;;  %v1004_v26 = vmul.f32 %v2070_v46, %v2070_v46  ;;  %v1005_v4 = vmul.f32 %v2062_v44, %v2062_v44  ;;  %s1582_s28 = scalar_lea.vmem %s1148_s27, 16  ;;  %s1588_s29 = scalar_lea.vmem %s1148_s27, 32 }
 0x152   : > { %v1006_v10 = vmul.f32 %v2086_v50, %v2086_v50  ;;  %p1583_p5 = scmp.ne.s32.totalorder %s1148_s27, %s1582_s28  ;;  %p1589_p4 = scmp.lt.s32.totalorder %s1148_s27, %s1148_s27 }
 0x153   : > { %v932_v61 = vadd.f32 %v2062_v44, %v931_v63  ;;  %v1059_v1 = vadd.f32 %v1058_v51, %v996_v49  ;;  %p1590_p7 = scmp.lt.s32.totalorder %s1588_s29, %s1582_s28 }
 0x154   : > { %p1584_p1 = pnand %p1583_p5, %p84_p2 }
 0x155   : > { %v933_v24 = vadd.f32 %v932_v61, %v2086_v50  ;;  %v1060_v12 = vadd.f32 %v1059_v1, %v997_v8  ;;  %v1007_v8 = vmul.f32 %v2078_v48, %v2078_v48  ;;  %v1008_v61 = vmul.f32 %v2102_v54, %v2102_v54  ;;  %p1591_p8 = por %p1590_p7, %p1589_p4 }
 0x156   : > { %v1009_v1 = vmul.f32 %v2094_v52, %v2094_v52  ;;  %p1585_p3 = pneg %p1584_p1 }
 0x157   : > { %v934_v30 = vadd.f32 %v2078_v48, %v933_v24  ;;  %v1061_v59 = vadd.f32 %v1060_v12, %v998_v14 }
 0x158   : > { %p1592_p9 = pnand %p1591_p8, %p1585_p3 }
 0x159   : > { %v935_v28 = vadd.f32 %v934_v30, %v2102_v54  ;;  %v1062_v55 = vadd.f32 %v1061_v59, %v999_v57  ;;  %v1010_v57 = vmul.f32 %v2118_v58, %v2118_v58  ;;  %v1011_v30 = vmul.f32 %v2110_v56, %v2110_v56 }
 0x15a   : > { %v1012_v59 = vmul.f32 %v2134_v62, %v2134_v62 }
 0x15b   : > { %v936_v34 = vadd.f32 %v2094_v52, %v935_v28  ;;  %v1063_v6 = vadd.f32 %v1062_v55, %v1000_v53 }
 0x15d   : > { %v937_v32 = vadd.f32 %v936_v34, %v2118_v58  ;;  %v1064_v20 = vadd.f32 %v1063_v6, %v1001_v18  ;;  %v1013_v18 = vmul.f32 %v2126_v60, %v2126_v60  ;;  %v1014_v34 = vmul.f32 %v2150_v2, %v2150_v2 }
 0x15e   : > { %v1015_v6 = vmul.f32 %v2142_v0, %v2142_v0 }
 0x15f   : > { %v938_v38 = vadd.f32 %v2110_v56, %v937_v32  ;;  %v1065_v3 = vadd.f32 %v1064_v20, %v1002_v16 }
 0x161   : > { %v939_v36 = vadd.f32 %v938_v38, %v2134_v62  ;;  %v1066_v49 = vadd.f32 %v1065_v3, %v1003_v22  ;;  %v1016_v22 = vmul.f32 %v1912_v7, %v1912_v7  ;;  %v1017_v38 = vmul.f32 %v1902_v5, %v1902_v5 }
 0x162   : > { %v1018_v3 = vmul.f32 %v1928_v11, %v1928_v11 }
 0x163   : > { %v940_v42 = vadd.f32 %v2126_v60, %v939_v36  ;;  %v1067_v63 = vadd.f32 %v1066_v49, %v1004_v26 }
 0x165   : > { %v941_v40 = vadd.f32 %v940_v42, %v2150_v2  ;;  %v1068_v51 = vadd.f32 %v1067_v63, %v1005_v4  ;;  %v1019_v4 = vmul.f32 %v1920_v9, %v1920_v9  ;;  %v1020_v42 = vmul.f32 %v1944_v15, %v1944_v15 }
 0x166   : > { %v1021_v63 = vmul.f32 %v1936_v13, %v1936_v13 }
 0x167   : > { %v942_v46 = vadd.f32 %v2142_v0, %v941_v40  ;;  %v1069_v14 = vadd.f32 %v1068_v51, %v1006_v10 }
 0x169   : > { %v943_v44 = vadd.f32 %v942_v46, %v1912_v7  ;;  %v1070_v24 = vadd.f32 %v1069_v14, %v1007_v8  ;;  %v1022_v8 = vmul.f32 %v1960_v19, %v1960_v19  ;;  %v1023_v46 = vmul.f32 %v1952_v17, %v1952_v17 }
 0x16a   : > { %v1024_v14 = vmul.f32 %v1976_v23, %v1976_v23 }
 0x16b   : > { %v944_v50 = vadd.f32 %v1902_v5, %v943_v44  ;;  %v1071_v12 = vadd.f32 %v1070_v24, %v1008_v61 }
 0x16d   : > { %v945_v48 = vadd.f32 %v944_v50, %v1928_v11  ;;  %v1072_v53 = vadd.f32 %v1071_v12, %v1009_v1  ;;  %v1025_v1 = vmul.f32 %v1968_v21, %v1968_v21  ;;  %v1026_v50 = vmul.f32 %v1992_v27, %v1992_v27 }
 0x16e   : > { %v1027_v12 = vmul.f32 %v1984_v25, %v1984_v25 }
 0x16f   : > { %v946_v54 = vadd.f32 %v1920_v9, %v945_v48  ;;  %v1073_v28 = vadd.f32 %v1072_v53, %v1010_v57 }
 0x171   : > { %v947_v52 = vadd.f32 %v946_v54, %v1944_v15  ;;  %v1074_v55 = vadd.f32 %v1073_v28, %v1011_v30  ;;  %v1028_v30 = vmul.f32 %v2008_v31, %v2008_v31  ;;  %v1029_v54 = vmul.f32 %v2000_v29, %v2000_v29 }
 0x172   : > { %v1030_v28 = vmul.f32 %v2024_v35, %v2024_v35 }
 0x173   : > { %v948_v58 = vadd.f32 %v1936_v13, %v947_v52  ;;  %v1075_v16 = vadd.f32 %v1074_v55, %v1012_v59  ;;  %v1031_v55 = vmul.f32 %v2016_v33, %v2016_v33 }
 0x175   : > { %v949_v56 = vadd.f32 %v948_v58, %v1960_v19  ;;  %v1076_v32 = vadd.f32 %v1075_v16, %v1013_v18  ;;  %v1032_v16 = vmul.f32 %v2040_v39, %v2040_v39 }
 0x177   : > { %v950_v62 = vadd.f32 %v1952_v17, %v949_v56  ;;  %v1077_v20 = vadd.f32 %v1076_v32, %v1014_v34  ;;  %v1033_v32 = vmul.f32 %v2032_v37, %v2032_v37 }
 0x179   : > { %v951_v60 = vadd.f32 %v950_v62, %v1976_v23  ;;  %v1078_v26 = vadd.f32 %v1077_v20, %v1015_v6  ;;  %v1034_v20 = vmul.f32 %v2056_v43, %v2056_v43 }
 0x17b   : > { %v952_v2 = vadd.f32 %v1968_v21, %v951_v60  ;;  %v1079_v36 = vadd.f32 %v1078_v26, %v1016_v22  ;;  %v1035_v26 = vmul.f32 %v2048_v41, %v2048_v41 }
 0x17d   : > { %v953_v0 = vadd.f32 %v952_v2, %v1992_v27  ;;  %v1080_v49 = vadd.f32 %v1079_v36, %v1017_v38  ;;  %v1036_v36 = vmul.f32 %v2072_v47, %v2072_v47 }
 0x17f   : > { %v954_v7 = vadd.f32 %v1984_v25, %v953_v0  ;;  %v1081_v10 = vadd.f32 %v1080_v49, %v1018_v3  ;;  %v2457_v25 = vld [vmem:[#allocation10_spill] sm:$0xff]  ;;  %v1037_v49 = vmul.f32 %v2064_v45, %v2064_v45 }
 0x181   : > { %v955_v5 = vadd.f32 %v954_v7, %v2008_v31  ;;  %v1082_v40 = vadd.f32 %v1081_v10, %v1019_v4  ;;  %v2458_v31 = vld [vmem:[#allocation9_spill] sm:$0xff]  ;;  %v1038_v10 = vmul.f32 %v2457_v25, %v2457_v25 }
 0x183   : > { %v956_v11 = vadd.f32 %v2000_v29, %v955_v5  ;;  %v1083_v51 = vadd.f32 %v1082_v40, %v1020_v42  ;;  %v2459_v29 = vld [vmem:[#allocation12_spill] sm:$0xff]  ;;  %v1039_v40 = vmul.f32 %v2458_v31, %v2458_v31 }
 0x185   : > { %v957_v9 = vadd.f32 %v956_v11, %v2024_v35  ;;  %v1084_v61 = vadd.f32 %v1083_v51, %v1021_v63  ;;  %v2460_v35 = vld [vmem:[#allocation11_spill] sm:$0xff]  ;;  %v1040_v51 = vmul.f32 %v2459_v29, %v2459_v29 }
 0x187   : > { %v958_v15 = vadd.f32 %v2016_v33, %v957_v9  ;;  %v1085_v44 = vadd.f32 %v1084_v61, %v1022_v8  ;;  %v2461_v33 = vld [vmem:[#allocation14_spill] sm:$0xff] }
 0x189   : > { %v959_v13 = vadd.f32 %v958_v15, %v2040_v39  ;;  %v1086_v24 = vadd.f32 %v1085_v44, %v1023_v46  ;;  %v2462_v39 = vld [vmem:[#allocation13_spill] sm:$0xff]  ;;  %v1041_v46 = vmul.f32 %v2460_v35, %v2460_v35 }
 0x18b   : > { %v960_v19 = vadd.f32 %v2032_v37, %v959_v13  ;;  %v1087_v57 = vadd.f32 %v1086_v24, %v1024_v14  ;;  %v2463_v37 = vld [vmem:[#allocation16_spill] sm:$0xff]  ;;  %v1042_v14 = vmul.f32 %v2461_v33, %v2461_v33 }
 0x18d   : > { %v961_v17 = vadd.f32 %v960_v19, %v2056_v43  ;;  %v1088_v48 = vadd.f32 %v1087_v57, %v1025_v1  ;;  %v2464_v43 = vld [vmem:[#allocation15_spill] sm:$0xff]  ;;  %v1043_v1 = vmul.f32 %v2462_v39, %v2462_v39 }
 0x18f   : > { %v962_v23 = vadd.f32 %v2048_v41, %v961_v17  ;;  %v1089_v53 = vadd.f32 %v1088_v48, %v1026_v50  ;;  %v2465_v41 = vld [vmem:[#allocation18_spill] sm:$0xff]  ;;  %v1044_v50 = vmul.f32 %v2463_v37, %v2463_v37 }
 0x191   : > { %v963_v21 = vadd.f32 %v962_v23, %v2072_v47  ;;  %v1090_v59 = vadd.f32 %v1089_v53, %v1027_v12  ;;  %v2466_v47 = vld [vmem:[#allocation17_spill] sm:$0xff]  ;;  %v1045_v12 = vmul.f32 %v2464_v43, %v2464_v43  ;;  %v911_v23 = vld [vmem:[#allocation4] sm:$0x1]  ;;  %v1046_v53 = vmul.f32 %v2465_v41, %v2465_v41 }
 0x193   : > { %v964_v27 = vadd.f32 %v2064_v45, %v963_v21  ;;  %v1091_v52 = vadd.f32 %v1090_v59, %v1028_v30  ;;  %v1047_v59 = vmul.f32 %v2466_v47, %v2466_v47 }
 0x195   : > { %v965_v18 = vadd.f32 %v964_v27, %v2457_v25  ;;  %v1092_v58 = vadd.f32 %v1091_v52, %v1029_v54 }
 0x197   : > { %v966_v34 = vadd.f32 %v2458_v31, %v965_v18  ;;  %v1093_v56 = vadd.f32 %v1092_v58, %v1030_v28 }
 0x199   : > { %v967_v6 = vadd.f32 %v966_v34, %v2459_v29  ;;  %v1094_v62 = vadd.f32 %v1093_v56, %v1031_v55 }
 0x19b   : > { %v968_v22 = vadd.f32 %v2460_v35, %v967_v6  ;;  %v1095_v60 = vadd.f32 %v1094_v62, %v1032_v16 }
 0x19d   : > { %v969_v38 = vadd.f32 %v968_v22, %v2461_v33  ;;  %v1096_v2 = vadd.f32 %v1095_v60, %v1033_v32 }
 0x19f   : > { %v970_v3 = vadd.f32 %v2462_v39, %v969_v38  ;;  %v1097_v0 = vadd.f32 %v1096_v2, %v1034_v20 }
 0x1a1   : > { %v971_v4 = vadd.f32 %v970_v3, %v2463_v37  ;;  %v1098_v7 = vadd.f32 %v1097_v0, %v1035_v26 }
 0x1a3   : > { %v972_v42 = vadd.f32 %v2464_v43, %v971_v4  ;;  %v1099_v5 = vadd.f32 %v1098_v7, %v1036_v36 }
 0x1a5   : > { %v973_v63 = vadd.f32 %v972_v42, %v2465_v41  ;;  %v1100_v11 = vadd.f32 %v1099_v5, %v1037_v49 }
 0x1a7   : > { %v974_v8 = vadd.f32 %v2466_v47, %v973_v63  ;;  %v1101_v9 = vadd.f32 %v1100_v11, %v1038_v10 }
 0x1a9   : > { %v975_v45 = vrot.slane %v974_v8, 4  ;;  %v1102_v61 = vadd.f32 %v1101_v9, %v1039_v40 }
 0x1ab   : > { %v976_v15 = vadd.f32 %v975_v45, %v974_v8  ;;  %v1103_v44 = vadd.f32 %v1102_v61, %v1040_v51 }
 0x1ad   : > { %v977_v13 = vrot.slane %v976_v15, 2  ;;  %v1104_v24 = vadd.f32 %v1103_v44, %v1041_v46 }
 0x1af   : > { %v978_v19 = vadd.f32 %v977_v13, %v976_v15  ;;  %v1105_v57 = vadd.f32 %v1104_v24, %v1042_v14 }
 0x1b1   : > { %v979_v17 = vrot.slane %v978_v19, 1  ;;  %v1106_v48 = vadd.f32 %v1105_v57, %v1043_v1 }
 0x1b3   : > { %v980_v30 = vadd.f32 %v979_v17, %v978_v19  ;;  %v1107_v21 = vadd.f32 %v1106_v48, %v1044_v50 }
 0x1b5   : > { %v981_v54 = vadd.f32 %v980_v30, %v911_v23  ;;  %v1108_v27 = vadd.f32 %v1107_v21, %v1045_v12 }
 0x1b7   : > { %982 = vst [vmem:[#allocation4] sm:$0x1] %v981_v54  ;;  %v1109_v28 = vadd.f32 %v1108_v27, %v1046_v53 }
 0x1b8   : > { %1595 = shalt.err (!%p1592_p9)
}
 0x1b9   : > { %1502 = dma.vmem_to_hbm [thread:$0]  (%p84_p2), %s1148_s27, 16, %s2423_s3, [#allocation5]   ;;  %v1110_v52 = vadd.f32 %v1109_v28, %v1047_v59  ;;  %v983_v34 = vld [vmem:[#allocation6] sm:$0x1] }
 0x1ba   : > { %s1675_s6 = smov [#allocation6]  }
 0x1bb   : > { %v1111_v25 = vrot.slane %v1110_v52, 4  ;;  %s1158_s7 = sshll.u32 %s1675_s6, 4  ;;  %s1159_s7 = int_to_ptr.vmem [resolvable:$true] %s1158_s7 }
 0x1bc   : > { %s1606_s8 = scalar_lea.vmem %s1159_s7, 16  ;;  %s1612_s9 = scalar_lea.vmem %s1159_s7, 32 }
 0x1bd   : > { %v1112_v18 = vadd.f32 %v1111_v25, %v1110_v52  ;;  %p1607_p10 = scmp.ne.s32.totalorder %s1159_s7, %s1606_s8  ;;  %p1613_p13 = scmp.lt.s32.totalorder %s1159_s7, %s1159_s7 }
 0x1be   : > { %p1614_p0 = scmp.lt.s32.totalorder %s1612_s9, %s1606_s8 }
 0x1bf   : > { %v1113_v55 = vrot.slane %v1112_v18, 2  ;;  %p1608_p11 = pnand %p1607_p10, %p84_p2 }
 0x1c0   : > { %p1615_p5 = por %p1614_p0, %p1613_p13 }
 0x1c1   : > { %v1114_v58 = vadd.f32 %v1113_v55, %v1112_v18  ;;  %p1609_p12 = pneg %p1608_p11 }
 0x1c3   : > { %v1115_v31 = vrot.slane %v1114_v58, 1  ;;  %p1616_p1 = pnand %p1615_p5, %p1609_p12 }
 0x1c5   : > { %v1116_v16 = vadd.f32 %v1115_v31, %v1114_v58 }
 0x1c7   : > { %v1117_v56 = vadd.f32 %v1116_v16, %v983_v34 }
 0x1c9   : > { %1118 = vst [vmem:[#allocation6] sm:$0x1] %v1117_v56 }
 0x1ca   : > { %1619 = shalt.err (!%p1616_p1)
}
 0x1cb   : > { %1504 = dma.vmem_to_hbm [thread:$0]  (%p84_p2), %s1159_s7, 16, %s2424_s4, [#allocation5]  }
 0x1cc   : > { %1647 = dma.done.wait (%p84_p2), [#allocation5], 32  }
 0x1cd   : > { %1649 = vsyncadd (%p84_p2), [#allocation5], 4294967264 }
 0x1ce PF: > { %p1518_p3 = scmp.ge.s32.totalorder %s1668_s18, 2  ;;  %s1178_s12 = sand.u32 1, %s1656_s15  }
 0x1cf   : > { %s1179_s13 = scalar_lea.sflag [#allocation3], %s1178_s12 }
 0x1d0   : > { %p1511_p4 = pnand %p1518_p3, %p1745_p6 }
 0x1d2   : > { %p1512_p7 = pneg %p1511_p4 }
 0x1d4   : > { %1651 = dma.done.wait (%p1512_p7), %s1179_s13, 8192  }
 0x1d5   : > { %1653 = vsyncadd (%p1512_p7), %s1179_s13, 4294959104  ;;  %p16_p8 = scmp.ge.s32.totalorder %s1726_s21, 6   ;;  %s2467_s15 = smov %s1660_s16 }
 0x1d6   : > { %s2468_s16 = smov %s1664_s17  ;;  %s2469_s17 = smov %s1737_s24 }
 0x1d7   : > { %s2470_s18 = smov %s1726_s21  ;;  %18 = sbr.rel (!%p16_p8) target bundleno = 4 (0x4), region = 83 }
 0x1dc   :  { %1184 = vsyncpa [#allocation3], 1 }
 0x1dd   :  { %1186 = vsyncpa [#allocation3 + $0x1], 1 }
 0x1de   :  { %1187 = vsyncpa [#allocation5], 1 }

</bundles_post_ra>
